<compile_context>
chip_gen: v7x
topology: tpu7x:2x2x1
jax: 0.10.0
libtpu: 0.0.40
codegen_flags: <defaults>
</compile_context>

<pallas_src>
import functools

import numpy as np
import jax
import jax.numpy as jnp
from jax.experimental import pallas as pl
from jax.experimental.pallas import tpu as pltpu

EPS = 1e-5
NEG_SLOPE = 0.01

PAD = 128                 # lane-padded width for every layer's features
WROWS = 128               # rows per padded weight block (input dim padded to 128)
NUM_W = 6                 # six Linear layers
V_BASE = NUM_W * WROWS    # 768: start of the (1,128) vector slots
VEC_STRIDE = 8            # each bias/gamma/beta gets an 8-row (sublane) aligned slot
NUM_VEC = 14              # b1,g1,be1, b2,g2,be2, b3, b4,g4,be4, b5,g5,be5, b6
TOTAL_ROWS = V_BASE + NUM_VEC * VEC_STRIDE  # 880 rows -> ~440 KiB fp32 slab


# --------------------------------------------------------------------------
# Kernel
# --------------------------------------------------------------------------
def _w(p_ref, i):
    """Padded (128, 128) weight block i (static, sublane-aligned slice)."""
    return p_ref[pl.ds(i * WROWS, WROWS), :]


def _v(p_ref, k):
    """(1, 128) vector k (bias / gamma / beta), 8-row-aligned slot."""
    return p_ref[pl.ds(V_BASE + k * VEC_STRIDE, 1), :]


def autoencoder_kernel(x_ref, p_ref, out_ref, *, latent_size):
    x = x_ref[...]  # (B, 128) fp32, padded lanes are zero

    def linear(h, wi, bk):
        return (jnp.dot(h, _w(p_ref, wi), preferred_element_type=jnp.float32)
                + _v(p_ref, bk))

    def bn_leaky(h, gk, bek):
        # BatchNorm1d training mode folded into one per-feature scale/shift FMA.
        gamma = _v(p_ref, gk)
        beta = _v(p_ref, bek)
        mean = jnp.mean(h, axis=0, keepdims=True)          # cross-sublane -> XLU
        d = h - mean
        var = jnp.mean(d * d, axis=0, keepdims=True)        # biased variance
        scale = gamma * jax.lax.rsqrt(var + EPS)             # rsqrt -> EUP slot
        shift = beta - mean * scale
        y = h * scale + shift
        return jnp.where(y > 0, y, NEG_SLOPE * y)             # LeakyReLU(0.01)

    # ---- encoder ----
    h = bn_leaky(linear(x, 0, 0), 1, 2)                # Linear(19->32) + BN + LeakyReLU
    h = bn_leaky(linear(h, 1, 3), 4, 5)                # Linear(32->64) + BN + LeakyReLU
    z = linear(h, 2, 6)                                # Linear(64->2); lanes >= 2 are zero

    # ---- decoder ----
    # latent->64: 2-deep contraction as a VPU outer product over valid latent
    # lanes (unrolled at trace time) instead of a nearly empty MXU pass.
    wlat = p_ref[pl.ds(3 * WROWS, 8), :]               # 8-row aligned; rows >= latent are zero
    h = _v(p_ref, 7)                                   # b4, broadcast over batch
    for j in range(latent_size):
        h = h + z[:, j:j + 1] * wlat[j:j + 1, :]
    h = bn_leaky(h, 8, 9)                              # BN(64) + LeakyReLU

    h = bn_leaky(linear(h, 4, 10), 11, 12)             # Linear(64->32) + BN + LeakyReLU
    out_ref[...] = linear(h, 5, 13)                    # Linear(32->19), lane-dense store


# --------------------------------------------------------------------------
# Host-side parameter construction / packing
# --------------------------------------------------------------------------
def init_params(key, input_size=19, latent_size=2):
    """Deterministic synthetic parameters. Weights stored as (in, out)."""
    dims = [
        (input_size, 32), (32, 64), (64, latent_size),   # encoder linears
        (latent_size, 64), (64, 32), (32, input_size),   # decoder linears
    ]
    bn_dims = {0: 32, 1: 64, 3: 64, 4: 32}               # layers followed by BN
    params = []
    for i, (din, dout) in enumerate(dims):
        key, kw, kb = jax.random.split(key, 3)
        bound = 1.0 / float(np.sqrt(din))
        w = jax.random.uniform(kw, (din, dout), jnp.float32, -bound, bound)
        b = jax.random.uniform(kb, (1, dout), jnp.float32, -bound, bound)
        params += [w, b]
        if i in bn_dims:
            n = bn_dims[i]
            key, kg, kbe = jax.random.split(key, 3)
            gamma = 1.0 + 0.1 * jax.random.normal(kg, (1, n), jnp.float32)
            beta = 0.1 * jax.random.normal(kbe, (1, n), jnp.float32)
            params += [gamma, beta]
    return params


def pack_params(params):
    """Pack the 20 parameter tensors into one lane-dense (880, 128) fp32 slab.

    Built with NumPy on the host so there is exactly one host->device transfer
    (and one HBM->VMEM DMA inside the kernel).
    """
    (w1, b1, g1, be1, w2, b2, g2, be2, w3, b3,
     w4, b4, g4, be4, w5, b5, g5, be5, w6, b6) = params
    buf = np.zeros((TOTAL_ROWS, PAD), np.float32)
    for i, w in enumerate([w1, w2, w3, w4, w5, w6]):
        w = np.asarray(w, np.float32)
        din, dout = w.shape
        buf[i * WROWS:i * WROWS + din, :dout] = w
    vecs = [b1, g1, be1, b2, g2, be2, b3, b4, g4, be4, b5, g5, be5, b6]
    for k, v in enumerate(vecs):
        v = np.asarray(v, np.float32).reshape(-1)
        buf[V_BASE + k * VEC_STRIDE, :v.shape[0]] = v
    return jnp.asarray(buf)


# --------------------------------------------------------------------------
# Wrapper
# --------------------------------------------------------------------------
def autoencoder_forward(x, params, latent_size=2):
    B, F = x.shape
    assert latent_size <= 8, "latent slot is one 8-row sublane group"
    x_pad = jnp.zeros((B, PAD), jnp.float32).at[:, :F].set(x.astype(jnp.float32))
    packed = pack_params(params)                       # single parameter slab
    vmem = pl.BlockSpec(memory_space=pltpu.MemorySpace.VMEM)
    out_pad = pl.pallas_call(
        functools.partial(autoencoder_kernel, latent_size=latent_size),
        out_shape=jax.ShapeDtypeStruct((B, PAD), jnp.float32),
        in_specs=[vmem, vmem],
        out_specs=vmem,
    )(x_pad, packed)
    return out_pad[:, :F]


# --------------------------------------------------------------------------
# Pure-JAX reference mirroring the PyTorch module (training-mode BN)
# --------------------------------------------------------------------------
def _bn_train_ref(h, gamma, beta):
    mean = jnp.mean(h, axis=0, keepdims=True)
    var = jnp.mean((h - mean) ** 2, axis=0, keepdims=True)
    return gamma * (h - mean) * jax.lax.rsqrt(var + EPS) + beta


def _leaky_ref(h):
    return jnp.where(h > 0, h, NEG_SLOPE * h)


def reference_forward(x, params):
    (w1, b1, g1, be1, w2, b2, g2, be2, w3, b3,
     w4, b4, g4, be4, w5, b5, g5, be5, w6, b6) = params
    h = _leaky_ref(_bn_train_ref(x @ w1 + b1, g1, be1))
    h = _leaky_ref(_bn_train_ref(h @ w2 + b2, g2, be2))
    z = h @ w3 + b3
    h = _leaky_ref(_bn_train_ref(z @ w4 + b4, g4, be4))
    h = _leaky_ref(_bn_train_ref(h @ w5 + b5, g5, be5))
    return h @ w6 + b6


if __name__ == "__main__":
    INPUT_SIZE = 19
    LATENT_SIZE = 2
    BATCH = 8

    key = jax.random.PRNGKey(0)
    key, kx = jax.random.split(key)
    x = jax.random.normal(kx, (BATCH, INPUT_SIZE), jnp.float32)

    params = init_params(key, INPUT_SIZE, LATENT_SIZE)

    out = autoencoder_forward(x, params, latent_size=LATENT_SIZE)
    out = jax.block_until_ready(out)

    ref = reference_forward(x, params)
    assert out.shape == (BATCH, INPUT_SIZE)
    assert jnp.allclose(out, ref, atol=1e-4, rtol=1e-4), "mismatch vs reference"

    print("KERNEL_OK")
</pallas_src>

<mosaic_0001>
module attributes {stable_mosaic.version = 11 : i64} {
  func.func @autoencoder_kernel(%arg0: memref<8x128xf32, #tpu.memory_space<vmem>>, %arg1: memref<880x128xf32, #tpu.memory_space<vmem>>, %arg2: memref<8x128xf32, #tpu.memory_space<vmem>>) attributes {dimension_semantics = [], scalar_prefetch = 0 : i64, scratch_operands = 0 : i64, tpu.core_type = #tpu.core_type<tc>} {
    %c0 = arith.constant 0 : index
    %c0_0 = arith.constant 0 : index
    %0 = vector.load %arg0[%c0, %c0_0] : memref<8x128xf32, #tpu.memory_space<vmem>>, vector<8x128xf32>
    %c0_1 = arith.constant 0 : index
    %c0_2 = arith.constant 0 : index
    %1 = vector.load %arg1[%c0_1, %c0_2] : memref<880x128xf32, #tpu.memory_space<vmem>>, vector<128x128xf32>
    %cst = arith.constant dense<0.000000e+00> : vector<8x128xf32>
    %2 = tpu.matmul %0, %1, %cst {dimension_numbers = #tpu.dot_dimension_numbers<[1], [0], [0], [1], [0, 0, 1, 1], [], []>} : vector<8x128xf32>, vector<128x128xf32>, vector<8x128xf32> -> vector<8x128xf32>
    %c768 = arith.constant 768 : index
    %c0_3 = arith.constant 0 : index
    %3 = vector.load %arg1[%c768, %c0_3] : memref<880x128xf32, #tpu.memory_space<vmem>>, vector<1x128xf32>
    %4 = vector.broadcast %3 : vector<1x128xf32> to vector<8x128xf32>
    %5 = arith.addf %2, %4 : vector<8x128xf32>
    %c776 = arith.constant 776 : index
    %c0_4 = arith.constant 0 : index
    %6 = vector.load %arg1[%c776, %c0_4] : memref<880x128xf32, #tpu.memory_space<vmem>>, vector<1x128xf32>
    %c784 = arith.constant 784 : index
    %c0_5 = arith.constant 0 : index
    %7 = vector.load %arg1[%c784, %c0_5] : memref<880x128xf32, #tpu.memory_space<vmem>>, vector<1x128xf32>
    %cst_6 = arith.constant dense<0.000000e+00> : vector<128xf32>
    %8 = vector.multi_reduction <add>, %5, %cst_6 [0] : vector<8x128xf32> to vector<128xf32>
    %9 = vector.shape_cast %8 : vector<128xf32> to vector<1x128xf32>
    %cst_7 = arith.constant 8.000000e+00 : f32
    %10 = vector.broadcast %cst_7 : f32 to vector<1x128xf32>
    %11 = arith.divf %9, %10 : vector<1x128xf32>
    %12 = vector.broadcast %11 : vector<1x128xf32> to vector<8x128xf32>
    %13 = arith.subf %5, %12 : vector<8x128xf32>
    %14 = arith.mulf %13, %13 : vector<8x128xf32>
    %cst_8 = arith.constant dense<0.000000e+00> : vector<128xf32>
    %15 = vector.multi_reduction <add>, %14, %cst_8 [0] : vector<8x128xf32> to vector<128xf32>
    %16 = vector.shape_cast %15 : vector<128xf32> to vector<1x128xf32>
    %cst_9 = arith.constant 8.000000e+00 : f32
    %17 = vector.broadcast %cst_9 : f32 to vector<1x128xf32>
    %18 = arith.divf %16, %17 : vector<1x128xf32>
    %cst_10 = arith.constant 9.99999974E-6 : f32
    %19 = vector.broadcast %cst_10 : f32 to vector<1x128xf32>
    %20 = arith.addf %18, %19 : vector<1x128xf32>
    %21 = math.rsqrt %20 : vector<1x128xf32>
    %22 = arith.mulf %6, %21 : vector<1x128xf32>
    %23 = arith.mulf %11, %22 : vector<1x128xf32>
    %24 = arith.subf %7, %23 : vector<1x128xf32>
    %25 = vector.broadcast %22 : vector<1x128xf32> to vector<8x128xf32>
    %26 = arith.mulf %5, %25 : vector<8x128xf32>
    %27 = vector.broadcast %24 : vector<1x128xf32> to vector<8x128xf32>
    %28 = arith.addf %26, %27 : vector<8x128xf32>
    %cst_11 = arith.constant 0.000000e+00 : f32
    %29 = vector.broadcast %cst_11 : f32 to vector<8x128xf32>
    %30 = arith.cmpf ogt, %28, %29 : vector<8x128xf32>
    %cst_12 = arith.constant 0.00999999977 : f32
    %31 = vector.broadcast %cst_12 : f32 to vector<8x128xf32>
    %32 = arith.mulf %31, %28 : vector<8x128xf32>
    %33 = arith.select %30, %28, %32 : vector<8x128xi1>, vector<8x128xf32>
    %c128 = arith.constant 128 : index
    %c0_13 = arith.constant 0 : index
    %34 = vector.load %arg1[%c128, %c0_13] : memref<880x128xf32, #tpu.memory_space<vmem>>, vector<128x128xf32>
    %cst_14 = arith.constant dense<0.000000e+00> : vector<8x128xf32>
    %35 = tpu.matmul %33, %34, %cst_14 {dimension_numbers = #tpu.dot_dimension_numbers<[1], [0], [0], [1], [0, 0, 1, 1], [], []>} : vector<8x128xf32>, vector<128x128xf32>, vector<8x128xf32> -> vector<8x128xf32>
    %c792 = arith.constant 792 : index
    %c0_15 = arith.constant 0 : index
    %36 = vector.load %arg1[%c792, %c0_15] : memref<880x128xf32, #tpu.memory_space<vmem>>, vector<1x128xf32>
    %37 = vector.broadcast %36 : vector<1x128xf32> to vector<8x128xf32>
    %38 = arith.addf %35, %37 : vector<8x128xf32>
    %c800 = arith.constant 800 : index
    %c0_16 = arith.constant 0 : index
    %39 = vector.load %arg1[%c800, %c0_16] : memref<880x128xf32, #tpu.memory_space<vmem>>, vector<1x128xf32>
    %c808 = arith.constant 808 : index
    %c0_17 = arith.constant 0 : index
    %40 = vector.load %arg1[%c808, %c0_17] : memref<880x128xf32, #tpu.memory_space<vmem>>, vector<1x128xf32>
    %cst_18 = arith.constant dense<0.000000e+00> : vector<128xf32>
    %41 = vector.multi_reduction <add>, %38, %cst_18 [0] : vector<8x128xf32> to vector<128xf32>
    %42 = vector.shape_cast %41 : vector<128xf32> to vector<1x128xf32>
    %cst_19 = arith.constant 8.000000e+00 : f32
    %43 = vector.broadcast %cst_19 : f32 to vector<1x128xf32>
    %44 = arith.divf %42, %43 : vector<1x128xf32>
    %45 = vector.broadcast %44 : vector<1x128xf32> to vector<8x128xf32>
    %46 = arith.subf %38, %45 : vector<8x128xf32>
    %47 = arith.mulf %46, %46 : vector<8x128xf32>
    %cst_20 = arith.constant dense<0.000000e+00> : vector<128xf32>
    %48 = vector.multi_reduction <add>, %47, %cst_20 [0] : vector<8x128xf32> to vector<128xf32>
    %49 = vector.shape_cast %48 : vector<128xf32> to vector<1x128xf32>
    %cst_21 = arith.constant 8.000000e+00 : f32
    %50 = vector.broadcast %cst_21 : f32 to vector<1x128xf32>
    %51 = arith.divf %49, %50 : vector<1x128xf32>
    %cst_22 = arith.constant 9.99999974E-6 : f32
    %52 = vector.broadcast %cst_22 : f32 to vector<1x128xf32>
    %53 = arith.addf %51, %52 : vector<1x128xf32>
    %54 = math.rsqrt %53 : vector<1x128xf32>
    %55 = arith.mulf %39, %54 : vector<1x128xf32>
    %56 = arith.mulf %44, %55 : vector<1x128xf32>
    %57 = arith.subf %40, %56 : vector<1x128xf32>
    %58 = vector.broadcast %55 : vector<1x128xf32> to vector<8x128xf32>
    %59 = arith.mulf %38, %58 : vector<8x128xf32>
    %60 = vector.broadcast %57 : vector<1x128xf32> to vector<8x128xf32>
    %61 = arith.addf %59, %60 : vector<8x128xf32>
    %cst_23 = arith.constant 0.000000e+00 : f32
    %62 = vector.broadcast %cst_23 : f32 to vector<8x128xf32>
    %63 = arith.cmpf ogt, %61, %62 : vector<8x128xf32>
    %cst_24 = arith.constant 0.00999999977 : f32
    %64 = vector.broadcast %cst_24 : f32 to vector<8x128xf32>
    %65 = arith.mulf %64, %61 : vector<8x128xf32>
    %66 = arith.select %63, %61, %65 : vector<8x128xi1>, vector<8x128xf32>
    %c256 = arith.constant 256 : index
    %c0_25 = arith.constant 0 : index
    %67 = vector.load %arg1[%c256, %c0_25] : memref<880x128xf32, #tpu.memory_space<vmem>>, vector<128x128xf32>
    %cst_26 = arith.constant dense<0.000000e+00> : vector<8x128xf32>
    %68 = tpu.matmul %66, %67, %cst_26 {dimension_numbers = #tpu.dot_dimension_numbers<[1], [0], [0], [1], [0, 0, 1, 1], [], []>} : vector<8x128xf32>, vector<128x128xf32>, vector<8x128xf32> -> vector<8x128xf32>
    %c816 = arith.constant 816 : index
    %c0_27 = arith.constant 0 : index
    %69 = vector.load %arg1[%c816, %c0_27] : memref<880x128xf32, #tpu.memory_space<vmem>>, vector<1x128xf32>
    %70 = vector.broadcast %69 : vector<1x128xf32> to vector<8x128xf32>
    %71 = arith.addf %68, %70 : vector<8x128xf32>
    %c384 = arith.constant 384 : index
    %c0_28 = arith.constant 0 : index
    %72 = vector.load %arg1[%c384, %c0_28] : memref<880x128xf32, #tpu.memory_space<vmem>>, vector<8x128xf32>
    %c824 = arith.constant 824 : index
    %c0_29 = arith.constant 0 : index
    %73 = vector.load %arg1[%c824, %c0_29] : memref<880x128xf32, #tpu.memory_space<vmem>>, vector<1x128xf32>
    %74 = vector.extract_strided_slice %71 {offsets = [0, 0], sizes = [8, 1], strides = [1, 1]} : vector<8x128xf32> to vector<8x1xf32>
    %75 = vector.extract_strided_slice %72 {offsets = [0, 0], sizes = [1, 128], strides = [1, 1]} : vector<8x128xf32> to vector<1x128xf32>
    %76 = vector.broadcast %74 : vector<8x1xf32> to vector<8x128xf32>
    %77 = vector.broadcast %75 : vector<1x128xf32> to vector<8x128xf32>
    %78 = arith.mulf %76, %77 : vector<8x128xf32>
    %79 = vector.broadcast %73 : vector<1x128xf32> to vector<8x128xf32>
    %80 = arith.addf %79, %78 : vector<8x128xf32>
    %81 = vector.extract_strided_slice %71 {offsets = [0, 1], sizes = [8, 1], strides = [1, 1]} : vector<8x128xf32> to vector<8x1xf32>
    %82 = vector.extract_strided_slice %72 {offsets = [1, 0], sizes = [1, 128], strides = [1, 1]} : vector<8x128xf32> to vector<1x128xf32>
    %83 = vector.broadcast %81 : vector<8x1xf32> to vector<8x128xf32>
    %84 = vector.broadcast %82 : vector<1x128xf32> to vector<8x128xf32>
    %85 = arith.mulf %83, %84 : vector<8x128xf32>
    %86 = arith.addf %80, %85 : vector<8x128xf32>
    %c832 = arith.constant 832 : index
    %c0_30 = arith.constant 0 : index
    %87 = vector.load %arg1[%c832, %c0_30] : memref<880x128xf32, #tpu.memory_space<vmem>>, vector<1x128xf32>
    %c840 = arith.constant 840 : index
    %c0_31 = arith.constant 0 : index
    %88 = vector.load %arg1[%c840, %c0_31] : memref<880x128xf32, #tpu.memory_space<vmem>>, vector<1x128xf32>
    %cst_32 = arith.constant dense<0.000000e+00> : vector<128xf32>
    %89 = vector.multi_reduction <add>, %86, %cst_32 [0] : vector<8x128xf32> to vector<128xf32>
    %90 = vector.shape_cast %89 : vector<128xf32> to vector<1x128xf32>
    %cst_33 = arith.constant 8.000000e+00 : f32
    %91 = vector.broadcast %cst_33 : f32 to vector<1x128xf32>
    %92 = arith.divf %90, %91 : vector<1x128xf32>
    %93 = vector.broadcast %92 : vector<1x128xf32> to vector<8x128xf32>
    %94 = arith.subf %86, %93 : vector<8x128xf32>
    %95 = arith.mulf %94, %94 : vector<8x128xf32>
    %cst_34 = arith.constant dense<0.000000e+00> : vector<128xf32>
    %96 = vector.multi_reduction <add>, %95, %cst_34 [0] : vector<8x128xf32> to vector<128xf32>
    %97 = vector.shape_cast %96 : vector<128xf32> to vector<1x128xf32>
    %cst_35 = arith.constant 8.000000e+00 : f32
    %98 = vector.broadcast %cst_35 : f32 to vector<1x128xf32>
    %99 = arith.divf %97, %98 : vector<1x128xf32>
    %cst_36 = arith.constant 9.99999974E-6 : f32
    %100 = vector.broadcast %cst_36 : f32 to vector<1x128xf32>
    %101 = arith.addf %99, %100 : vector<1x128xf32>
    %102 = math.rsqrt %101 : vector<1x128xf32>
    %103 = arith.mulf %87, %102 : vector<1x128xf32>
    %104 = arith.mulf %92, %103 : vector<1x128xf32>
    %105 = arith.subf %88, %104 : vector<1x128xf32>
    %106 = vector.broadcast %103 : vector<1x128xf32> to vector<8x128xf32>
    %107 = arith.mulf %86, %106 : vector<8x128xf32>
    %108 = vector.broadcast %105 : vector<1x128xf32> to vector<8x128xf32>
    %109 = arith.addf %107, %108 : vector<8x128xf32>
    %cst_37 = arith.constant 0.000000e+00 : f32
    %110 = vector.broadcast %cst_37 : f32 to vector<8x128xf32>
    %111 = arith.cmpf ogt, %109, %110 : vector<8x128xf32>
    %cst_38 = arith.constant 0.00999999977 : f32
    %112 = vector.broadcast %cst_38 : f32 to vector<8x128xf32>
    %113 = arith.mulf %112, %109 : vector<8x128xf32>
    %114 = arith.select %111, %109, %113 : vector<8x128xi1>, vector<8x128xf32>
    %c512 = arith.constant 512 : index
    %c0_39 = arith.constant 0 : index
    %115 = vector.load %arg1[%c512, %c0_39] : memref<880x128xf32, #tpu.memory_space<vmem>>, vector<128x128xf32>
    %cst_40 = arith.constant dense<0.000000e+00> : vector<8x128xf32>
    %116 = tpu.matmul %114, %115, %cst_40 {dimension_numbers = #tpu.dot_dimension_numbers<[1], [0], [0], [1], [0, 0, 1, 1], [], []>} : vector<8x128xf32>, vector<128x128xf32>, vector<8x128xf32> -> vector<8x128xf32>
    %c848 = arith.constant 848 : index
    %c0_41 = arith.constant 0 : index
    %117 = vector.load %arg1[%c848, %c0_41] : memref<880x128xf32, #tpu.memory_space<vmem>>, vector<1x128xf32>
    %118 = vector.broadcast %117 : vector<1x128xf32> to vector<8x128xf32>
    %119 = arith.addf %116, %118 : vector<8x128xf32>
    %c856 = arith.constant 856 : index
    %c0_42 = arith.constant 0 : index
    %120 = vector.load %arg1[%c856, %c0_42] : memref<880x128xf32, #tpu.memory_space<vmem>>, vector<1x128xf32>
    %c864 = arith.constant 864 : index
    %c0_43 = arith.constant 0 : index
    %121 = vector.load %arg1[%c864, %c0_43] : memref<880x128xf32, #tpu.memory_space<vmem>>, vector<1x128xf32>
    %cst_44 = arith.constant dense<0.000000e+00> : vector<128xf32>
    %122 = vector.multi_reduction <add>, %119, %cst_44 [0] : vector<8x128xf32> to vector<128xf32>
    %123 = vector.shape_cast %122 : vector<128xf32> to vector<1x128xf32>
    %cst_45 = arith.constant 8.000000e+00 : f32
    %124 = vector.broadcast %cst_45 : f32 to vector<1x128xf32>
    %125 = arith.divf %123, %124 : vector<1x128xf32>
    %126 = vector.broadcast %125 : vector<1x128xf32> to vector<8x128xf32>
    %127 = arith.subf %119, %126 : vector<8x128xf32>
    %128 = arith.mulf %127, %127 : vector<8x128xf32>
    %cst_46 = arith.constant dense<0.000000e+00> : vector<128xf32>
    %129 = vector.multi_reduction <add>, %128, %cst_46 [0] : vector<8x128xf32> to vector<128xf32>
    %130 = vector.shape_cast %129 : vector<128xf32> to vector<1x128xf32>
    %cst_47 = arith.constant 8.000000e+00 : f32
    %131 = vector.broadcast %cst_47 : f32 to vector<1x128xf32>
    %132 = arith.divf %130, %131 : vector<1x128xf32>
    %cst_48 = arith.constant 9.99999974E-6 : f32
    %133 = vector.broadcast %cst_48 : f32 to vector<1x128xf32>
    %134 = arith.addf %132, %133 : vector<1x128xf32>
    %135 = math.rsqrt %134 : vector<1x128xf32>
    %136 = arith.mulf %120, %135 : vector<1x128xf32>
    %137 = arith.mulf %125, %136 : vector<1x128xf32>
    %138 = arith.subf %121, %137 : vector<1x128xf32>
    %139 = vector.broadcast %136 : vector<1x128xf32> to vector<8x128xf32>
    %140 = arith.mulf %119, %139 : vector<8x128xf32>
    %141 = vector.broadcast %138 : vector<1x128xf32> to vector<8x128xf32>
    %142 = arith.addf %140, %141 : vector<8x128xf32>
    %cst_49 = arith.constant 0.000000e+00 : f32
    %143 = vector.broadcast %cst_49 : f32 to vector<8x128xf32>
    %144 = arith.cmpf ogt, %142, %143 : vector<8x128xf32>
    %cst_50 = arith.constant 0.00999999977 : f32
    %145 = vector.broadcast %cst_50 : f32 to vector<8x128xf32>
    %146 = arith.mulf %145, %142 : vector<8x128xf32>
    %147 = arith.select %144, %142, %146 : vector<8x128xi1>, vector<8x128xf32>
    %c640 = arith.constant 640 : index
    %c0_51 = arith.constant 0 : index
    %148 = vector.load %arg1[%c640, %c0_51] : memref<880x128xf32, #tpu.memory_space<vmem>>, vector<128x128xf32>
    %cst_52 = arith.constant dense<0.000000e+00> : vector<8x128xf32>
    %149 = tpu.matmul %147, %148, %cst_52 {dimension_numbers = #tpu.dot_dimension_numbers<[1], [0], [0], [1], [0, 0, 1, 1], [], []>} : vector<8x128xf32>, vector<128x128xf32>, vector<8x128xf32> -> vector<8x128xf32>
    %c872 = arith.constant 872 : index
    %c0_53 = arith.constant 0 : index
    %150 = vector.load %arg1[%c872, %c0_53] : memref<880x128xf32, #tpu.memory_space<vmem>>, vector<1x128xf32>
    %151 = vector.broadcast %150 : vector<1x128xf32> to vector<8x128xf32>
    %152 = arith.addf %149, %151 : vector<8x128xf32>
    %c0_54 = arith.constant 0 : index
    %c0_55 = arith.constant 0 : index
    %153 = vector.load %arg2[%c0_54, %c0_55] : memref<8x128xf32, #tpu.memory_space<vmem>>, vector<8x128xf32>
    tpu.vector_store %arg2[%c0_54, %c0_55], %152 {strides = array<i32>} : memref<8x128xf32, #tpu.memory_space<vmem>>, vector<8x128xf32>,
    return
  }
}

</mosaic_0001>

<bundles_post_ra>
// kernel: tpu_custom_call.1
= control target key start
LH: loop header
LB: loop body
LE: loop exit
PB: predicated region body
PF: predicated region fallthrough
CT: control target
= control target key end

     0   :  { %7 = vsyncpa [#allocation3], 0  ;;  %s1294_s0 = inlined_call_operand.hbm [shape: f32[8,128], index: 0, kind: input, shape index: {}]   ;;  %s1295_s1 = inlined_call_operand.hbm [shape: f32[880,128], index: 1, kind: input, shape index: {}]   ;;  %s1296_s2 = inlined_call_operand.hbm [shape: f32[8,128], index: 2, kind: output, shape index: {}]  }
   0x1   :  { %8 = vsyncpa [#allocation6], 0 }
   0x2   :  { %9 = vsyncpa [#allocation4], 0  ;;  %s1161_s9 = smov [#allocation2]   ;;  %s1162_s11 = smov [#allocation5]  }
   0x3   :  { %s16_s10 = sshll.u32 %s1161_s9, 4  ;;  %s25_s12 = sshll.u32 %s1162_s11, 4  ;;  %s17_s10 = int_to_ptr.vmem [resolvable:$true] %s16_s10  ;;  %s1186_s12 = int_to_ptr.vmem [resolvable:$true] %s25_s12 }
   0x4   :  { %s1089_s15 = scalar_lea.hbm %s1294_s0, 128 }
   0x5   :  { %p1090_p0 = scmp.ne.s32.totalorder %s1294_s0, %s1089_s15  ;;  %p1093_p1 = scmp.lt.u32.totalorder %s1089_s15, %s1294_s0 }
   0x7   :  { %p1095_p2 = pnand %p1093_p1, %p1090_p0 }
   0x9   :  { %1098 = shalt.err (!%p1095_p2)
}
   0xa   :  { %s1099_s20 = scalar_lea.vmem %s17_s10, 128  ;;  %p1104_p4 = scmp.lt.s32.totalorder %s17_s10, %s17_s10 }
   0xb   :  { %p1100_p3 = scmp.ne.s32.totalorder %s17_s10, %s1099_s20  ;;  %p1105_p5 = scmp.lt.s32.totalorder %s1099_s20, %s1099_s20 }
   0xd   :  { %p1106_p6 = por %p1105_p5, %p1104_p4 }
   0xf   :  { %p1107_p7 = pnand %p1106_p6, %p1100_p3 }
  0x11   :  { %1110 = shalt.err (!%p1107_p7)
}
  0x12   :  { %19 = dma.hbm_to_vmem [thread:$0]  %s1294_s0, 128, %s17_s10, [#allocation3]  }
  0x13   :  { %s1111_s25 = scalar_lea.hbm %s1295_s1, 14080 }
  0x14   :  { %p1112_p8 = scmp.ne.s32.totalorder %s1295_s1, %s1111_s25  ;;  %p1115_p9 = scmp.lt.u32.totalorder %s1111_s25, %s1295_s1 }
  0x16   :  { %p1117_p10 = pnand %p1115_p9, %p1112_p8 }
  0x18   :  { %1120 = shalt.err (!%p1117_p10)
}
  0x19   :  { %s1121_s30 = scalar_lea.vmem %s1186_s12, 14080  ;;  %p1126_p12 = scmp.lt.s32.totalorder %s1186_s12, %s1186_s12 }
  0x1a   :  { %p1122_p11 = scmp.ne.s32.totalorder %s1186_s12, %s1121_s30  ;;  %p1127_p13 = scmp.lt.s32.totalorder %s1121_s30, %s1121_s30 }
  0x1c   :  { %p1128_p0 = por %p1127_p13, %p1126_p12 }
  0x1e   :  { %p1129_p1 = pnand %p1128_p0, %p1122_p11 }
  0x20   :  { %1132 = shalt.err (!%p1129_p1)
}
  0x21   :  { %s1163_s0 = smov 128   ;;  %s1164_s3 = smov 8  }
  0x22   :  { %31 = dma.hbm_to_vmem [thread:$0]  %s1295_s1, 14080, %s1186_s12, [#allocation6], %s1163_s0, %s1163_s0, %s1164_s3  }
  0x23   :  { %1155 = dma.done.wait [#allocation3], 128  }
  0x24   :  { %1156 = vsyncadd [#allocation3], 4294967168 }
  0x25   :  { %1157 = dma.done.wait [#allocation6], 14080  }
  0x26   :  { %1158 = vsyncadd [#allocation6], 4294953216  ;;  %v1165_v0 = vmov 0.0|0.0   ;;  %vm1166_vm0 = vmmov 0   ;;  %v1167_v1 = vmov 0.0   ;;  %v39_v2 = vld [vmem:[#allocation5] sm:$0xff] }
  0x27   :  { %949 = vmatprep.subr.bf16.mxu0 %v1165_v0  ;;  %806 = vmatprep.mubr.msk.f32.mxu0 %vm1166_vm0, %v1167_v1  ;;  %v40_v3 = vld [vmem:[#allocation5 + $0x8] sm:$0xff]  ;;  %v41_v4 = vld [vmem:[#allocation5 + $0x10] sm:$0xff]  ;;  %v42_v6 = vld [vmem:[#allocation5 + $0x18] sm:$0xff]  ;;  %s1170_s1 = smov [#allocation7]  }
  0x28   :  { %973 = vmatprep.subr.bf16.mxu1 %v1165_v0  ;;  %841 = vmatprep.mubr.msk.f32.mxu1 %vm1166_vm0, %v1167_v1  ;;  %v950_v5 = vpack.c.bf16 %v40_v3, %v39_v2  ;;  %v953_v7 = vpack.c.bf16 %v42_v6, %v41_v4  ;;  %v43_v8 = vld [vmem:[#allocation5 + $0x20] sm:$0xff]  ;;  %v44_v9 = vld [vmem:[#allocation5 + $0x28] sm:$0xff]  ;;  %v45_v11 = vld [vmem:[#allocation5 + $0x30] sm:$0xff]  ;;  %s673_s6 = sshll.u32 %s1170_s1, 4  ;;  %s674_s6 = int_to_ptr.vmem [resolvable:$true] %s673_s6 }
  0x29   :  { %v956_v10 = vpack.c.bf16 %v44_v9, %v43_v8  ;;  %v46_v12 = vld [vmem:[#allocation5 + $0x38] sm:$0xff]  ;;  %v47_v14 = vld [vmem:[#allocation5 + $0x40] sm:$0xff]  ;;  %v48_v15 = vld [vmem:[#allocation5 + $0x48] sm:$0xff]  ;;  %s1133_s7 = scalar_lea.vmem %s674_s6, 128  ;;  %p1138_p3 = scmp.lt.s32.totalorder %s674_s6, %s674_s6 }
  0x2a   :  { %951 = vmatpush3.bf16.msra.mxu0 %v950_v5  ;;  %v959_v13 = vpack.c.bf16 %v46_v12, %v45_v11  ;;  %v962_v16 = vpack.c.bf16 %v48_v15, %v47_v14  ;;  %v49_v17 = vld [vmem:[#allocation5 + $0x50] sm:$0xff]  ;;  %v50_v18 = vld [vmem:[#allocation5 + $0x58] sm:$0xff]  ;;  %v51_v20 = vld [vmem:[#allocation5 + $0x60] sm:$0xff]  ;;  %p1134_p2 = scmp.ne.s32.totalorder %s674_s6, %s1133_s7  ;;  %p1139_p4 = scmp.lt.s32.totalorder %s1133_s7, %s1133_s7 }
  0x2b   :  { %952 = vmatprep.subr.bf16.mxu0 %v1165_v0  ;;  %v965_v19 = vpack.c.bf16 %v50_v18, %v49_v17  ;;  %v52_v21 = vld [vmem:[#allocation5 + $0x68] sm:$0xff]  ;;  %v53_v23 = vld [vmem:[#allocation5 + $0x70] sm:$0xff]  ;;  %v54_v24 = vld [vmem:[#allocation5 + $0x78] sm:$0xff] }
  0x2c   :  { %v968_v22 = vpack.c.bf16 %v52_v21, %v51_v20  ;;  %v971_v25 = vpack.c.bf16 %v54_v24, %v53_v23  ;;  %v38_v26 = vld [vmem:[#allocation2] sm:$0xff]  ;;  %v167_v27 = vld [vmem:[#allocation5 + $0x80] sm:$0xff]  ;;  %v168_v28 = vld [vmem:[#allocation5 + $0x88] sm:$0xff]  ;;  %p1140_p5 = por %p1139_p4, %p1138_p3 }
  0x2d   :  { %v974_v29 = vpack.c.bf16 %v168_v28, %v167_v27  ;;  %v169_v30 = vld [vmem:[#allocation5 + $0x90] sm:$0xff]  ;;  %v170_v31 = vld [vmem:[#allocation5 + $0x98] sm:$0xff]  ;;  %v171_v33 = vld [vmem:[#allocation5 + $0xa0] sm:$0xff] }
  0x2e   :  { %954 = vmatpush3.bf16.msra.mxu0 %v953_v7  ;;  %v977_v32 = vpack.c.bf16 %v170_v31, %v169_v30  ;;  %v172_v34 = vld [vmem:[#allocation5 + $0xa8] sm:$0xff]  ;;  %v173_v36 = vld [vmem:[#allocation5 + $0xb0] sm:$0xff]  ;;  %v174_v37 = vld [vmem:[#allocation5 + $0xb8] sm:$0xff]  ;;  %p1141_p6 = pnand %p1140_p5, %p1134_p2 }
  0x2f   :  { %955 = vmatprep.subr.bf16.mxu0 %v1165_v0  ;;  %975 = vmatpush3.bf16.msra.mxu1 %v974_v29  ;;  %v980_v35 = vpack.c.bf16 %v172_v34, %v171_v33  ;;  %v983_v38 = vpack.c.bf16 %v174_v37, %v173_v36  ;;  %v175_v39 = vld [vmem:[#allocation5 + $0xc0] sm:$0xff]  ;;  %v176_v40 = vld [vmem:[#allocation5 + $0xc8] sm:$0xff]  ;;  %v177_v42 = vld [vmem:[#allocation5 + $0xd0] sm:$0xff] }
  0x30   :  { %976 = vmatprep.subr.bf16.mxu1 %v1165_v0  ;;  %v986_v41 = vpack.c.bf16 %v176_v40, %v175_v39  ;;  %v178_v43 = vld [vmem:[#allocation5 + $0xd8] sm:$0xff]  ;;  %v179_v45 = vld [vmem:[#allocation5 + $0xe0] sm:$0xff]  ;;  %v180_v46 = vld [vmem:[#allocation5 + $0xe8] sm:$0xff] }
  0x31   :  { %v989_v44 = vpack.c.bf16 %v178_v43, %v177_v42  ;;  %v992_v47 = vpack.c.bf16 %v180_v46, %v179_v45  ;;  %v181_v48 = vld [vmem:[#allocation5 + $0xf0] sm:$0xff]  ;;  %v182_v49 = vld [vmem:[#allocation5 + $0xf8] sm:$0xff]  ;;  %v683_v51 = vld [vmem:[#allocation5 + $0x300] ss:$0 sm:$0xff] }
  0x32   :  { %957 = vmatpush3.bf16.msra.mxu0 %v956_v10  ;;  %v995_v50 = vpack.c.bf16 %v182_v49, %v181_v48  ;;  %v154_v10 = vlaneseq  ;;  %v130_v12 = vld [vmem:[#allocation5 + $0x308] sm:$0x1]  ;;  %v296_v28 = vld [vmem:[#allocation5 + $0x110] sm:$0xff]  ;;  %v297_v29 = vld [vmem:[#allocation5 + $0x118] sm:$0xff] }
  0x33   :  { %958 = vmatprep.subr.bf16.mxu0 %v1165_v0  ;;  %978 = vmatpush3.bf16.msra.mxu1 %v977_v32  ;;  %v1001_v30 = vpack.c.bf16 %v297_v29, %v296_v28  ;;  %v298_v31 = vld [vmem:[#allocation5 + $0x120] sm:$0xff]  ;;  %v299_v32 = vld [vmem:[#allocation5 + $0x128] sm:$0xff]  ;;  %v300_v34 = vld [vmem:[#allocation5 + $0x130] sm:$0xff] }
  0x34   :  { %979 = vmatprep.subr.bf16.mxu1 %v1165_v0  ;;  %v1241_v11 = vshrl.u32 %v154_v10, 7  ;;  %v1004_v33 = vpack.c.bf16 %v299_v32, %v298_v31  ;;  %v302_v37 = vld [vmem:[#allocation5 + $0x140] sm:$0xff]  ;;  %v304_v40 = vld [vmem:[#allocation5 + $0x150] sm:$0xff]  ;;  %v684_v49 = vld [vmem:[#allocation5 + $0x318] ss:$0 sm:$0xff] }
  0x35   :  { %v306_v43 = vld [vmem:[#allocation5 + $0x160] sm:$0xff]  ;;  %v308_v46 = vld [vmem:[#allocation5 + $0x170] sm:$0xff]  ;;  %v449_v29 = vld [vmem:[#allocation5 + $0x208] sm:$0xff] }
  0x36   :  { %960 = vmatpush3.bf16.msra.mxu0 %v959_v13  ;;  %v1244_v13 = vsub.s32 0, %v1241_v11  ;;  %v448_v28 = vld [vmem:[#allocation5 + $0x200] sm:$0xff]  ;;  %v450_v31 = vld [vmem:[#allocation5 + $0x210] sm:$0xff]  ;;  %v451_v32 = vld [vmem:[#allocation5 + $0x218] sm:$0xff] }
  0x37   :  { %961 = vmatprep.subr.bf16.mxu0 %v1165_v0  ;;  %981 = vmatpush3.bf16.msra.mxu1 %v980_v35  ;;  %v301_v35 = vld [vmem:[#allocation5 + $0x138] sm:$0xff] }
  0x38   :  { %982 = vmatprep.subr.bf16.mxu1 %v1165_v0  ;;  %v1007_v36 = vpack.c.bf16 %v301_v35, %v300_v34  ;;  %v453_v34 = vld [vmem:[#allocation5 + $0x228] sm:$0xff] }
  0x3a   :  { %963 = vmatpush3.bf16.msra.mxu0 %v962_v16  ;;  %v131_v16 = vld [vmem:[#allocation5 + $0x310] sm:$0x1] }
  0x3b   :  { %964 = vmatprep.subr.bf16.mxu0 %v1165_v0  ;;  %984 = vmatpush3.bf16.msra.mxu1 %v983_v38  ;;  %v303_v38 = vld [vmem:[#allocation5 + $0x148] sm:$0xff] }
  0x3c   :  { %985 = vmatprep.subr.bf16.mxu1 %v1165_v0  ;;  %v1010_v39 = vpack.c.bf16 %v303_v38, %v302_v37  ;;  %v455_v37 = vld [vmem:[#allocation5 + $0x238] sm:$0xff] }
  0x3e   :  { %966 = vmatpush3.bf16.msra.mxu0 %v965_v19 }
  0x3f   :  { %967 = vmatprep.subr.bf16.mxu0 %v1165_v0  ;;  %987 = vmatpush3.bf16.msra.mxu1 %v986_v41  ;;  %v305_v41 = vld [vmem:[#allocation5 + $0x158] sm:$0xff] }
  0x40   :  { %988 = vmatprep.subr.bf16.mxu1 %v1165_v0  ;;  %v1013_v42 = vpack.c.bf16 %v305_v41, %v304_v40  ;;  %v457_v40 = vld [vmem:[#allocation5 + $0x248] sm:$0xff] }
  0x42   :  { %969 = vmatpush3.bf16.msra.mxu0 %v968_v22 }
  0x43   :  { %970 = vmatprep.subr.bf16.mxu0 %v1165_v0  ;;  %990 = vmatpush3.bf16.msra.mxu1 %v989_v44  ;;  %v307_v44 = vld [vmem:[#allocation5 + $0x168] sm:$0xff] }
  0x44   :  { %991 = vmatprep.subr.bf16.mxu1 %v1165_v0  ;;  %v1016_v45 = vpack.c.bf16 %v307_v44, %v306_v43  ;;  %v459_v43 = vld [vmem:[#allocation5 + $0x258] sm:$0xff] }
  0x46   :  { %972 = vmatpush3.bf16.msra.mxu0 %v971_v25  ;;  %v294_v25 = vld [vmem:[#allocation5 + $0x100] sm:$0xff] }
  0x47   :  { %997 = vmatprep.subr.bf16.mxu0 %v1165_v0  ;;  %993 = vmatpush3.bf16.msra.mxu1 %v992_v47  ;;  %v309_v47 = vld [vmem:[#allocation5 + $0x178] sm:$0xff] }
  0x48   :  { %994 = vmatprep.subr.bf16.mxu1 %v1165_v0  ;;  %v1019_v48 = vpack.c.bf16 %v309_v47, %v308_v46  ;;  %v461_v46 = vld [vmem:[#allocation5 + $0x268] sm:$0xff] }
  0x49   :  { %807 = vmatmul.mubr.f32.vlgmr.msra.gmra.mrb[0].mxu0 %v38_v26  ;;  %v295_v26 = vld [vmem:[#allocation5 + $0x108] sm:$0xff] }
  0x4a   :  { %876 = vmatprep.mubr.msk.f32.mxu0 %vm1166_vm0, %v1167_v1  ;;  %v998_v27 = vpack.c.bf16 %v295_v26, %v294_v25 }
  0x4b   :  { %996 = vmatpush3.bf16.msra.mxu1 %v995_v50 }
  0x4c   :  { %1021 = vmatprep.subr.bf16.mxu1 %v1165_v0  ;;  %999 = vmatpush3.bf16.msra.mxu0 %v998_v27  ;;  %v1169_v27 = vmov 1  }
  0x4d   :  { %1000 = vmatprep.subr.bf16.mxu0 %v1165_v0 }
  0x50   :  { %1002 = vmatpush3.bf16.msra.mxu0 %v1001_v30  ;;  %v1022_v30 = vpack.c.bf16 %v449_v29, %v448_v28 }
  0x51   :  { %1003 = vmatprep.subr.bf16.mxu0 %v1165_v0 }
  0x54   :  { %1005 = vmatpush3.bf16.msra.mxu0 %v1004_v33  ;;  %v1025_v33 = vpack.c.bf16 %v451_v32, %v450_v31  ;;  %v576_v31 = vld [vmem:[#allocation5 + $0x288] sm:$0xff] }
  0x55   :  { %1006 = vmatprep.subr.bf16.mxu0 %v1165_v0 }
  0x58   :  { %1008 = vmatpush3.bf16.msra.mxu0 %v1007_v36  ;;  %v454_v36 = vld [vmem:[#allocation5 + $0x230] sm:$0xff] }
  0x59   :  { %1009 = vmatprep.subr.bf16.mxu0 %v1165_v0  ;;  %v1031_v38 = vpack.c.bf16 %v455_v37, %v454_v36  ;;  %v580_v36 = vld [vmem:[#allocation5 + $0x2a8] sm:$0xff] }
  0x5c   :  { %1011 = vmatpush3.bf16.msra.mxu0 %v1010_v39  ;;  %v456_v39 = vld [vmem:[#allocation5 + $0x240] sm:$0xff] }
  0x5d   :  { %1012 = vmatprep.subr.bf16.mxu0 %v1165_v0  ;;  %v1034_v41 = vpack.c.bf16 %v457_v40, %v456_v39  ;;  %v582_v39 = vld [vmem:[#allocation5 + $0x2b8] sm:$0xff] }
  0x60   :  { %1014 = vmatpush3.bf16.msra.mxu0 %v1013_v42  ;;  %v458_v42 = vld [vmem:[#allocation5 + $0x250] sm:$0xff] }
  0x61   :  { %1015 = vmatprep.subr.bf16.mxu0 %v1165_v0  ;;  %v1037_v44 = vpack.c.bf16 %v459_v43, %v458_v42  ;;  %v584_v42 = vld [vmem:[#allocation5 + $0x2c8] sm:$0xff] }
  0x64   :  { %1017 = vmatpush3.bf16.msra.mxu0 %v1016_v45  ;;  %v460_v45 = vld [vmem:[#allocation5 + $0x260] sm:$0xff] }
  0x65   :  { %1018 = vmatprep.subr.bf16.mxu0 %v1165_v0  ;;  %v1040_v47 = vpack.c.bf16 %v461_v46, %v460_v45  ;;  %v586_v45 = vld [vmem:[#allocation5 + $0x2d8] sm:$0xff] }
  0x68   :  { %1020 = vmatpush3.bf16.msra.mxu0 %v1019_v48  ;;  %v462_v48 = vld [vmem:[#allocation5 + $0x270] sm:$0xff] }
  0x69   :  { %1045 = vmatprep.subr.bf16.mxu0 %v1165_v0 }
 0x11c   :  { %v126_v52 = vpop.f32.mrb[0].mxu0 }
 0x11d   :  { %v127_v53 = vadd.f32 %v683_v51, %v126_v52  ;;  %v808_v54 = vpop.f32.mrb[1].mxu0 }
 0x11f   :  { %v132_v55 = vrot.slane %v127_v53, 4 }
 0x121   :  { %v133_v56 = vadd.f32 %v132_v55, %v127_v53 }
 0x123   :  { %v134_v57 = vrot.slane %v133_v56, 2 }
 0x125   :  { %v135_v58 = vadd.f32 %v134_v57, %v133_v56 }
 0x127   :  { %v136_v59 = vrot.slane %v135_v58, 1 }
 0x129   :  { %v137_v60 = vadd.f32 %v136_v59, %v135_v58 }
 0x12b   :  { %v139_v61 = vmul.f32 0.125, %v137_v60 }
 0x12d   :  { %v140_v62 = vsub.f32 %v127_v53, %v139_v61 }
 0x12f   :  { %v141_v63 = vmul.f32 %v140_v62, %v140_v62 }
 0x131   :  { %v142_v2 = vrot.slane %v141_v63, 4 }
 0x133   :  { %v143_v3 = vadd.f32 %v142_v2, %v141_v63 }
 0x135   :  { %v144_v4 = vrot.slane %v143_v3, 2 }
 0x137   :  { %v145_v5 = vadd.f32 %v144_v4, %v143_v3 }
 0x139   :  { %v146_v6 = vrot.slane %v145_v5, 1 }
 0x13b   :  { %v147_v7 = vadd.f32 %v146_v6, %v145_v5 }
 0x13d   :  { %v148_v8 = vmul.f32 0.125, %v147_v7 }
 0x13f   :  { %v149_v9 = vadd.f32 1e-05, %v148_v8  ;;  %v258_v8 = vld [vmem:[#allocation5 + $0x320] sm:$0x1] }
 0x141   :  { %1081 = vrsqrt.f32 %v149_v9 }
 0x14b   :  { %v1082_v14 = vpop.eup %1081 }
 0x14c   :  { %v151_v15 = vmul.f32 %v1082_v14, %v130_v12  ;;  %v259_v12 = vld [vmem:[#allocation5 + $0x328] sm:$0x1] }
 0x14e   :  { %v152_v17 = vmul.f32 %v151_v15, %v139_v61  ;;  %v157_v18 = vrot.slane %v151_v15, %v1244_v13 }
 0x150   :  { %v153_v19 = vsub.f32 %v131_v16, %v152_v17  ;;  %v158_v20 = vmul.f32 %v157_v18, %v127_v53 }
 0x152   :  { %v162_v21 = vrot.slane %v153_v19, %v1244_v13 }
 0x154   :  { %v163_v22 = vadd.f32 %v162_v21, %v158_v20 }
 0x156   :  { %vm164_vm1 = vcmp.gt.f32.partialorder %v163_v22, 0.0  ;;  %v165_v23 = vmul.f32 0.01, %v163_v22 }
 0x158   :  { %v166_v24 = vsel %vm164_vm1, %v163_v22, %v165_v23  ;;  %v1168_v22 = vmov 0   ;;  %v685_v23 = vld [vmem:[#allocation5 + $0x330] ss:$0 sm:$0xff] }
 0x159   :  { %842 = vmatmul.mubr.f32.vlgmr.msra.gmra.mrb[0].mxu1 %v166_v24  ;;  %1079 = vset.pattern.permute.xlu0 %v1168_v22 }
 0x15a   :  { %911 = vmatprep.mubr.msk.f32.mxu1 %vm1166_vm0, %v1167_v1  ;;  %1023 = vmatpush3.bf16.msra.mxu1 %v1022_v30  ;;  %v575_v30 = vld [vmem:[#allocation5 + $0x280] sm:$0xff] }
 0x15b   :  { %1024 = vmatprep.subr.bf16.mxu1 %v1165_v0  ;;  %v1046_v32 = vpack.c.bf16 %v576_v31, %v575_v30 }
 0x15e   :  { %1026 = vmatpush3.bf16.msra.mxu1 %v1025_v33  ;;  %v577_v33 = vld [vmem:[#allocation5 + $0x290] sm:$0xff] }
 0x15f   :  { %1027 = vmatprep.subr.bf16.mxu1 %v1165_v0 }
 0x22c   :  { %v254_v50 = vpop.f32.mrb[0].mxu1 }
 0x22d   :  { %v255_v51 = vadd.f32 %v684_v49, %v254_v50  ;;  %v843_v52 = vpop.f32.mrb[1].mxu1  ;;  %v463_v49 = vld [vmem:[#allocation5 + $0x278] sm:$0xff] }
 0x22e   :  { %v1043_v50 = vpack.c.bf16 %v463_v49, %v462_v48  ;;  %v588_v48 = vld [vmem:[#allocation5 + $0x2e8] sm:$0xff] }
 0x22f   :  { %v260_v53 = vrot.slane %v255_v51, 4 }
 0x231   :  { %v261_v54 = vadd.f32 %v260_v53, %v255_v51  ;;  %v408_v53 = vsub.s32 1, %v1241_v11 }
 0x233   :  { %v262_v55 = vrot.slane %v261_v54, 2 }
 0x235   :  { %v263_v56 = vadd.f32 %v262_v55, %v261_v54 }
 0x237   :  { %v264_v57 = vrot.slane %v263_v56, 1 }
 0x239   :  { %v265_v58 = vadd.f32 %v264_v57, %v263_v56  ;;  %v686_v57 = vld [vmem:[#allocation5 + $0x338] ss:$0 sm:$0xff] }
 0x23b   :  { %v266_v59 = vmul.f32 0.125, %v265_v58 }
 0x23d   :  { %v267_v60 = vsub.f32 %v255_v51, %v266_v59 }
 0x23f   :  { %v268_v61 = vmul.f32 %v267_v60, %v267_v60 }
 0x241   :  { %v269_v62 = vrot.slane %v268_v61, 4 }
 0x243   :  { %v270_v63 = vadd.f32 %v269_v62, %v268_v61 }
 0x245   :  { %v271_v2 = vrot.slane %v270_v63, 2 }
 0x247   :  { %v272_v3 = vadd.f32 %v271_v2, %v270_v63 }
 0x249   :  { %v273_v4 = vrot.slane %v272_v3, 1 }
 0x24b   :  { %v274_v5 = vadd.f32 %v273_v4, %v272_v3 }
 0x24d   :  { %v275_v6 = vmul.f32 0.125, %v274_v5 }
 0x24f   :  { %v276_v7 = vadd.f32 1e-05, %v275_v6 }
 0x251   :  { %1083 = vrsqrt.f32 %v276_v7 }
 0x25b   :  { %v1084_v9 = vpop.eup %1083 }
 0x25c   :  { %v278_v10 = vmul.f32 %v1084_v9, %v258_v8 }
 0x25e   :  { %v279_v14 = vmul.f32 %v278_v10, %v266_v59  ;;  %v284_v15 = vrot.slane %v278_v10, %v1244_v13 }
 0x260   :  { %v280_v16 = vsub.f32 %v259_v12, %v279_v14  ;;  %v285_v17 = vmul.f32 %v284_v15, %v255_v51  ;;  %v385_v51 = vld [vmem:[#allocation5 + $0x180] sm:$0xff] }
 0x261   :  { %v395_v52 = vrot.slane %v385_v51, %v1244_v13  ;;  %v409_v56 = vrot.slane %v385_v51, %v408_v53  ;;  %v590_v51 = vld [vmem:[#allocation5 + $0x2f8] sm:$0xff]  ;;  %v687_v53 = vld [vmem:[#allocation5 + $0x350] ss:$0 sm:$0xff] }
 0x262   :  { %v289_v18 = vrot.slane %v280_v16, %v1244_v13 }
 0x264   :  { %v290_v19 = vadd.f32 %v289_v18, %v285_v17  ;;  %v412_v18 = vld [vmem:[#allocation5 + $0x340] sm:$0x1] }
 0x266   :  { %vm291_vm2 = vcmp.gt.f32.partialorder %v290_v19, 0.0  ;;  %v292_v20 = vmul.f32 0.01, %v290_v19 }
 0x268   :  { %v293_v21 = vsel %vm291_vm2, %v290_v19, %v292_v20 }
 0x269   :  { %877 = vmatmul.mubr.f32.vlgmr.msra.gmra.mrb[2].mxu0 %v293_v21  ;;  %v413_v21 = vld [vmem:[#allocation5 + $0x348] sm:$0x1] }
 0x26a   :  { %946 = vmatprep.mubr.msk.f32.mxu0 %vm1166_vm0, %v1167_v1  ;;  %v452_v1 = vld [vmem:[#allocation5 + $0x220] sm:$0xff]  ;;  %1047 = vmatpush3.bf16.msra.mxu0 %v1046_v32 }
 0x26b   :  { %v1028_v35 = vpack.c.bf16 %v453_v34, %v452_v1  ;;  %1048 = vmatprep.subr.bf16.mxu0 %v1165_v0  ;;  %v578_v1 = vld [vmem:[#allocation5 + $0x298] sm:$0xff] }
 0x26c   :  { %v1049_v34 = vpack.c.bf16 %v578_v1, %v577_v33 }
 0x26d   :  { %1029 = vmatpush3.bf16.msra.mxu1 %v1028_v35  ;;  %v579_v35 = vld [vmem:[#allocation5 + $0x2a0] sm:$0xff] }
 0x26e   :  { %1030 = vmatprep.subr.bf16.mxu1 %v1165_v0  ;;  %1050 = vmatpush3.bf16.msra.mxu0 %v1049_v34  ;;  %v1052_v37 = vpack.c.bf16 %v580_v36, %v579_v35 }
 0x26f   :  { %1051 = vmatprep.subr.bf16.mxu0 %v1165_v0 }
 0x271   :  { %1032 = vmatpush3.bf16.msra.mxu1 %v1031_v38  ;;  %v581_v38 = vld [vmem:[#allocation5 + $0x2b0] sm:$0xff] }
 0x272   :  { %1033 = vmatprep.subr.bf16.mxu1 %v1165_v0  ;;  %1053 = vmatpush3.bf16.msra.mxu0 %v1052_v37  ;;  %v1055_v40 = vpack.c.bf16 %v582_v39, %v581_v38 }
 0x273   :  { %1054 = vmatprep.subr.bf16.mxu0 %v1165_v0 }
 0x275   :  { %1035 = vmatpush3.bf16.msra.mxu1 %v1034_v41  ;;  %v583_v41 = vld [vmem:[#allocation5 + $0x2c0] sm:$0xff] }
 0x276   :  { %1036 = vmatprep.subr.bf16.mxu1 %v1165_v0  ;;  %1056 = vmatpush3.bf16.msra.mxu0 %v1055_v40  ;;  %v1058_v43 = vpack.c.bf16 %v584_v42, %v583_v41 }
 0x277   :  { %1057 = vmatprep.subr.bf16.mxu0 %v1165_v0 }
 0x279   :  { %1038 = vmatpush3.bf16.msra.mxu1 %v1037_v44  ;;  %v585_v44 = vld [vmem:[#allocation5 + $0x2d0] sm:$0xff] }
 0x27a   :  { %1039 = vmatprep.subr.bf16.mxu1 %v1165_v0  ;;  %1059 = vmatpush3.bf16.msra.mxu0 %v1058_v43  ;;  %v1061_v46 = vpack.c.bf16 %v586_v45, %v585_v44 }
 0x27b   :  { %1060 = vmatprep.subr.bf16.mxu0 %v1165_v0 }
 0x27d   :  { %1041 = vmatpush3.bf16.msra.mxu1 %v1040_v47  ;;  %v587_v47 = vld [vmem:[#allocation5 + $0x2e0] sm:$0xff] }
 0x27e   :  { %1042 = vmatprep.subr.bf16.mxu1 %v1165_v0  ;;  %1062 = vmatpush3.bf16.msra.mxu0 %v1061_v46  ;;  %v1064_v49 = vpack.c.bf16 %v588_v48, %v587_v47 }
 0x27f   :  { %1063 = vmatprep.subr.bf16.mxu0 %v1165_v0 }
 0x281   :  { %1044 = vmatpush3.bf16.msra.mxu1 %v1043_v50  ;;  %v589_v50 = vld [vmem:[#allocation5 + $0x2f0] sm:$0xff] }
 0x282   :  { %1065 = vmatpush3.bf16.msra.mxu0 %v1064_v49 }
 0x283   :  { %1066 = vmatprep.subr.bf16.mxu0 %v1165_v0 }
 0x33c   :  { %v381_v24 = vpop.f32.mrb[2].mxu0 }
 0x33d   :  { %v382_v25 = vadd.f32 %v685_v23, %v381_v24  ;;  %v878_v26 = vpop.f32.mrb[3].mxu0 }
 0x33f   :  { %389 = vperm.xlu0 %1079, %v382_v25  }
 0x343   :  { %1080 = vset.pattern.permute.xlu0 %v1169_v27 }
 0x344   :  { %403 = vperm.xlu0 %1080, %v382_v25  }
 0x3be   :  { %v390_v54 = vpop.permute.xlu0 %389 }
 0x3bf   :  { %v396_v55 = vmul.f32 %v395_v52, %v390_v54  ;;  %v1067_v52 = vpack.c.bf16 %v590_v51, %v589_v50 }
 0x3c1   :  { %v401_v59 = vadd.f32 %v686_v57, %v396_v55  ;;  %1068 = vmatpush3.bf16.msra.mxu0 %v1067_v52 }
 0x3c3   :  { %v404_v58 = vpop.permute.xlu0 %403 }
 0x3c4   :  { %v410_v60 = vmul.f32 %v409_v56, %v404_v58 }
 0x3c6   :  { %v411_v61 = vadd.f32 %v410_v60, %v401_v59 }
 0x3c8   :  { %v414_v62 = vrot.slane %v411_v61, 4 }
 0x3ca   :  { %v415_v63 = vadd.f32 %v414_v62, %v411_v61 }
 0x3cc   :  { %v416_v2 = vrot.slane %v415_v63, 2 }
 0x3ce   :  { %v417_v3 = vadd.f32 %v416_v2, %v415_v63 }
 0x3d0   :  { %v418_v4 = vrot.slane %v417_v3, 1 }
 0x3d2   :  { %v419_v5 = vadd.f32 %v418_v4, %v417_v3 }
 0x3d4   :  { %v420_v6 = vmul.f32 0.125, %v419_v5 }
 0x3d6   :  { %v421_v7 = vsub.f32 %v411_v61, %v420_v6 }
 0x3d8   :  { %v422_v8 = vmul.f32 %v421_v7, %v421_v7 }
 0x3da   :  { %v423_v9 = vrot.slane %v422_v8, 4 }
 0x3dc   :  { %v424_v10 = vadd.f32 %v423_v9, %v422_v8 }
 0x3de   :  { %v425_v11 = vrot.slane %v424_v10, 2 }
 0x3e0   :  { %v426_v12 = vadd.f32 %v425_v11, %v424_v10  ;;  %v539_v11 = vld [vmem:[#allocation5 + $0x358] sm:$0x1] }
 0x3e2   :  { %v427_v14 = vrot.slane %v426_v12, 1 }
 0x3e4   :  { %v428_v15 = vadd.f32 %v427_v14, %v426_v12 }
 0x3e6   :  { %v429_v16 = vmul.f32 0.125, %v428_v15  ;;  %v540_v15 = vld [vmem:[#allocation5 + $0x360] sm:$0x1] }
 0x3e8   :  { %v430_v17 = vadd.f32 1e-05, %v429_v16 }
 0x3ea   :  { %1085 = vrsqrt.f32 %v430_v17 }
 0x3f4   :  { %v1086_v19 = vpop.eup %1085 }
 0x3f5   :  { %v432_v20 = vmul.f32 %v1086_v19, %v412_v18 }
 0x3f7   :  { %v433_v22 = vmul.f32 %v432_v20, %v420_v6  ;;  %v438_v23 = vrot.slane %v432_v20, %v1244_v13 }
 0x3f9   :  { %v434_v24 = vsub.f32 %v413_v21, %v433_v22  ;;  %v439_v25 = vmul.f32 %v438_v23, %v411_v61 }
 0x3fb   :  { %v443_v26 = vrot.slane %v434_v24, %v1244_v13  ;;  %v688_v24 = vld [vmem:[#allocation5 + $0x368] ss:$0 sm:$0xff] }
 0x3fd   :  { %v444_v27 = vadd.f32 %v443_v26, %v439_v25 }
 0x3ff   :  { %vm445_vm3 = vcmp.gt.f32.partialorder %v444_v27, 0.0  ;;  %v446_v28 = vmul.f32 0.01, %v444_v27 }
 0x401   :  { %v447_v29 = vsel %vm445_vm3, %v444_v27, %v446_v28 }
 0x402   :  { %912 = vmatmul.mubr.f32.vlgmr.msra.gmra.mrb[2].mxu1 %v447_v29 }
 0x4d5   :  { %v535_v54 = vpop.f32.mrb[2].mxu1 }
 0x4d6   :  { %v536_v55 = vadd.f32 %v687_v53, %v535_v54  ;;  %v913_v56 = vpop.f32.mrb[3].mxu1 }
 0x4d8   :  { %v541_v57 = vrot.slane %v536_v55, 4 }
 0x4da   :  { %v542_v58 = vadd.f32 %v541_v57, %v536_v55 }
 0x4dc   :  { %v543_v59 = vrot.slane %v542_v58, 2 }
 0x4de   :  { %v544_v60 = vadd.f32 %v543_v59, %v542_v58 }
 0x4e0   :  { %v545_v61 = vrot.slane %v544_v60, 1 }
 0x4e2   :  { %v546_v62 = vadd.f32 %v545_v61, %v544_v60 }
 0x4e4   :  { %v547_v63 = vmul.f32 0.125, %v546_v62 }
 0x4e6   :  { %v548_v2 = vsub.f32 %v536_v55, %v547_v63 }
 0x4e8   :  { %v549_v3 = vmul.f32 %v548_v2, %v548_v2 }
 0x4ea   :  { %v550_v4 = vrot.slane %v549_v3, 4 }
 0x4ec   :  { %v551_v5 = vadd.f32 %v550_v4, %v549_v3 }
 0x4ee   :  { %v552_v6 = vrot.slane %v551_v5, 2 }
 0x4f0   :  { %v553_v7 = vadd.f32 %v552_v6, %v551_v5 }
 0x4f2   :  { %v554_v8 = vrot.slane %v553_v7, 1 }
 0x4f4   :  { %v555_v0 = vadd.f32 %v554_v8, %v553_v7 }
 0x4f6   :  { %v556_v9 = vmul.f32 0.125, %v555_v0 }
 0x4f8   :  { %v557_v10 = vadd.f32 1e-05, %v556_v9 }
 0x4fa   :  { %1087 = vrsqrt.f32 %v557_v10 }
 0x504   :  { %v1088_v12 = vpop.eup %1087 }
 0x505   :  { %v559_v14 = vmul.f32 %v1088_v12, %v539_v11 }
 0x507   :  { %v560_v16 = vmul.f32 %v559_v14, %v547_v63  ;;  %v565_v17 = vrot.slane %v559_v14, %v1244_v13 }
 0x509   :  { %v561_v18 = vsub.f32 %v540_v15, %v560_v16  ;;  %v566_v19 = vmul.f32 %v565_v17, %v536_v55 }
 0x50b   :  { %v570_v20 = vrot.slane %v561_v18, %v1244_v13 }
 0x50d   :  { %v571_v21 = vadd.f32 %v570_v20, %v566_v19 }
 0x50f   :  { %vm572_vm4 = vcmp.gt.f32.partialorder %v571_v21, 0.0  ;;  %v573_v22 = vmul.f32 0.01, %v571_v21 }
 0x511   :  { %v574_v23 = vsel %vm572_vm4, %v571_v21, %v573_v22 }
 0x512   :  { %947 = vmatmul.mubr.f32.vlgmr.msra.gmra.mrb[4].mxu0 %v574_v23 }
 0x5e5   :  { %v662_v25 = vpop.f32.mrb[4].mxu0 }
 0x5e6   :  { %v663_v26 = vadd.f32 %v688_v24, %v662_v25  ;;  %v948_v27 = vpop.f32.mrb[5].mxu0 }
 0x5e8   :  { %666 = vst [vmem:[#allocation7] sm:$0xff] %v663_v26 }
 0x5e9   :  { %1144 = shalt.err (!%p1141_p6)
}
 0x5ea   :  { %s1145_s10 = scalar_lea.hbm %s1296_s2, 128 }
 0x5eb   :  { %p1146_p7 = scmp.ne.s32.totalorder %s1296_s2, %s1145_s10  ;;  %p1149_p8 = scmp.lt.u32.totalorder %s1145_s10, %s1296_s2 }
 0x5ed   :  { %p1151_p9 = pnand %p1149_p8, %p1146_p7 }
 0x5ef   :  { %1154 = shalt.err (!%p1151_p9)
}
 0x5f0   :  { %676 = dma.vmem_to_hbm [thread:$0]  %s674_s6, 128, %s1296_s2, [#allocation4]  }
 0x5f1   :  { %1159 = dma.done.wait [#allocation4], 128  }
 0x5f2   :  { %1160 = vsyncadd [#allocation4], 4294967168 }
 0x5f3   :  { %680 = vsyncpa [#allocation3], 1 }
 0x5f4   :  { %681 = vsyncpa [#allocation6], 1 }
 0x5f5   :  { %682 = vsyncpa [#allocation4], 1 }

</bundles_post_ra>
